<compile_context>
chip_gen: v5e
topology: v5e:2x2
jax: 0.10.0
libtpu: 0.0.40
codegen_flags: <defaults>
</compile_context>

<pallas_src>
import jax
import jax.numpy as jnp
from jax.experimental import pallas as pl
from jax.experimental.pallas import tpu as pltpu

WINDOW = 25     # gaussian(25, 11.2) from EyeNet.__init__
SIGMA = 11.2
HALF = WINDOW // 2   # band half-width = 12


def _gaussian_1d(window_size: int, sigma: float) -> jnp.ndarray:
    # Mirrors EyeNet.gaussian()
    x = jnp.arange(window_size, dtype=jnp.float32) - window_size // 2
    if window_size % 2 == 0:
        x = x + 0.5
    g = jnp.exp(-(x ** 2) / (2.0 * sigma ** 2))
    return g / jnp.sum(g)


def _conv_matrix(n: int, g: jnp.ndarray) -> jnp.ndarray:
    # A[i, j] = g[j - i + half] (0 outside the band) so that A @ img applies a
    # zero-padded 'same' cross-correlation with taps g along that axis.
    half = g.shape[0] // 2
    i = jnp.arange(n)[:, None]
    j = jnp.arange(n)[None, :]
    k = j - i + half
    valid = (k >= 0) & (k < g.shape[0])
    return jnp.where(valid, g[jnp.clip(k, 0, g.shape[0] - 1)], 0.0).astype(jnp.float32)


def _pick_tile(dim: int, target: int = 256) -> int:
    """Largest divisor of `dim` that is <= target and a multiple of 8 (>=16);
    falls back to the full dim (dense along that axis) if none exists."""
    if dim <= target:
        return dim
    for t in range(target, 15, -1):
        if dim % t == 0 and t % 8 == 0:
            return t
    return dim


def _eyenet_post_kernel(x_ref, ah_ref, aw_ref, bias_ref, out_ref, acc_ref):
    # grid = (batch b, H-tile i, band-step o in {0,1,2}); o is the reduction axis.
    i = pl.program_id(1)
    o = pl.program_id(2)
    n_hblk = pl.num_programs(1)
    k = i + o - 1                       # K block of the banded row-pass matmul

    @pl.when(o == 0)
    def _init():
        acc_ref[...] = jnp.zeros_like(acc_ref)

    # Only the in-range band blocks contribute (edge tiles are clamped in the
    # index_map and masked out here).
    @pl.when((k >= 0) & (k < n_hblk))
    def _accumulate():
        a = ah_ref[...]                                    # (TH, TH) bf16 band block
        xb = x_ref[0, 0, :, :].astype(jnp.bfloat16)        # (TH, W) class-1 logits
        acc_ref[...] += jnp.dot(a, xb, preferred_element_type=jnp.float32)

    @pl.when(o == pl.num_programs(2) - 1)
    def _finalize():
        rows = acc_ref[...].astype(jnp.bfloat16)           # row-smoothed tile
        sm = jnp.dot(rows, aw_ref[...], preferred_element_type=jnp.float32)
        out_ref[0, 0, :, :] = sm + bias_ref[...]           # fused center-bias add (f32)


def eyenet_forward_post(seg_out: jnp.ndarray, center_bias: jnp.ndarray) -> jnp.ndarray:
    """seg_out: (N, 2, H, W) backbone logits; center_bias: (H, W). Returns (N, 1, H, W)."""
    n, c, h, w = seg_out.shape
    assert c == 2, "fcn_resnet50 head was configured with num_classes=2"

    g = _gaussian_1d(WINDOW, SIGMA)
    a_h = _conv_matrix(h, g).astype(jnp.bfloat16)   # banded (H, H), only band blocks are DMAed
    a_w = _conv_matrix(w, g).astype(jnp.bfloat16)   # (W, W), VMEM-resident (constant index_map)
    bias = center_bias.astype(jnp.float32)

    th = _pick_tile(h)
    n_hblk = h // th
    # |i_blk - k_blk| <= 1 band coverage needs tile >= band half-width.
    assert n_hblk == 1 or th >= HALF, (th, HALF)

    def x_map(b, i, o):
        k = jnp.clip(i + o - 1, 0, n_hblk - 1)
        return (b, 1, k, 0)             # channel block 1 only -> class-0 never read

    def ah_map(b, i, o):
        k = jnp.clip(i + o - 1, 0, n_hblk - 1)
        return (i, k)                   # diagonal / first off-diagonal band block

    return pl.pallas_call(
        _eyenet_post_kernel,
        out_shape=jax.ShapeDtypeStruct((n, 1, h, w), jnp.float32),
        grid_spec=pltpu.PrefetchScalarGridSpec(
            num_scalar_prefetch=0,
            grid=(n, n_hblk, 3),
            in_specs=[
                pl.BlockSpec((1, 1, th, w), x_map),                 # class-1 logits tile
                pl.BlockSpec((th, th), ah_map),                     # A_h band block
                pl.BlockSpec((w, w), lambda b, i, o: (0, 0)),       # A_w (resident)
                pl.BlockSpec((th, w), lambda b, i, o: (i, 0)),      # center bias tile
            ],
            out_specs=pl.BlockSpec((1, 1, th, w), lambda b, i, o: (b, 0, i, 0)),
            scratch_shapes=[pltpu.VMEM((th, w), jnp.float32)],      # f32 accumulator
        ),
        compiler_params=pltpu.CompilerParams(
            dimension_semantics=("parallel", "parallel", "arbitrary"),
            vmem_limit_bytes=48 * 1024 * 1024,
        ),
    )(seg_out, a_h, a_w, bias)


def _reference(seg_out, center_bias):
    # Plain-JAX f32 reference of the same tail: conv2d(x[:,1:2], outer(g,g), 'same') + bias
    g = _gaussian_1d(WINDOW, SIGMA)
    k2d = jnp.outer(g, g)[None, None]                                   # (1,1,25,25)
    x = seg_out[:, 1:2, :, :]
    smooth = jax.lax.conv_general_dilated(
        x, k2d, window_strides=(1, 1), padding="SAME",
        dimension_numbers=("NCHW", "OIHW", "NCHW"))
    return smooth + center_bias[None, None]


if __name__ == "__main__":
    key = jax.random.PRNGKey(0)
    n, h, w = 2, 16, 16

    # Deterministic synthetic backbone output (stand-in for fcn_resnet50 logits).
    seg_out = jax.random.normal(key, (n, 2, h, w), dtype=jnp.float32)

    # Deterministic synthetic center-bias density (positive, center-peaked),
    # stand-in for np.load('center_bias_density.npy').
    yy = jnp.arange(h, dtype=jnp.float32) - (h - 1) / 2.0
    xx = jnp.arange(w, dtype=jnp.float32) - (w - 1) / 2.0
    density = jnp.exp(-(yy[:, None] ** 2 + xx[None, :] ** 2) / (2.0 * (h / 4.0) ** 2))
    center_bias = density / jnp.sum(density)

    out = eyenet_forward_post(seg_out, center_bias)
    jax.block_until_ready(out)

    ref = _reference(seg_out, center_bias)
    assert out.shape == (n, 1, h, w), out.shape
    # bf16 MXU inputs with f32 accumulation -> loosened tolerance vs pure-f32 ref.
    max_err = float(jnp.max(jnp.abs(out - ref)))
    assert jnp.allclose(out, ref, rtol=2e-2, atol=5e-3), max_err
    print("KERNEL_OK")
</pallas_src>

<mosaic_0001>
module attributes {stable_mosaic.version = 11 : i64} {
  func.func @_eyenet_post_kernel(%arg0: i32, %arg1: i32, %arg2: i32, %arg3: memref<1x1x16x16xf32, #tpu.memory_space<vmem>>, %arg4: memref<16x16xbf16, #tpu.memory_space<vmem>>, %arg5: memref<16x16xbf16, #tpu.memory_space<vmem>>, %arg6: memref<16x16xf32, #tpu.memory_space<vmem>>, %arg7: memref<1x1x16x16xf32, #tpu.memory_space<vmem>>, %arg8: memref<16x16xf32, #tpu.memory_space<vmem>>) attributes {dimension_semantics = [#tpu.dimension_semantics<parallel>, #tpu.dimension_semantics<parallel>, #tpu.dimension_semantics<arbitrary>], iteration_bounds = array<i64: 2, 1, 3>, scalar_prefetch = 0 : i64, scratch_operands = 1 : i64, tpu.core_type = #tpu.core_type<tc>, window_params = [{transform_indices = @transform_0, window_bounds = array<i64: 1, 1, 16, 16>}, {transform_indices = @transform_1, window_bounds = array<i64: 16, 16>}, {pipeline_mode = #tpu.pipeline_mode<synchronous>, transform_indices = @transform_2, window_bounds = array<i64: 16, 16>}, {transform_indices = @transform_3, window_bounds = array<i64: 16, 16>}, {transform_indices = @transform_4, window_bounds = array<i64: 1, 1, 16, 16>}]} {
    %0 = arith.addi %arg1, %arg2 : i32
    %c1_i32 = arith.constant 1 : i32
    %1 = arith.subi %0, %c1_i32 : i32
    %c0_i32 = arith.constant 0 : i32
    %2 = arith.cmpi eq, %arg2, %c0_i32 : i32
    %3 = arith.extui %2 : i1 to i32
    %c0_i32_0 = arith.constant 0 : i32
    %4 = arith.cmpi ne, %3, %c0_i32_0 : i32
    scf.if %4 {
      %cst = arith.constant 0.000000e+00 : f32
      %13 = vector.broadcast %cst : f32 to vector<16x16xf32>
      %c0 = arith.constant 0 : index
      %c0_5 = arith.constant 0 : index
      %14 = vector.load %arg8[%c0, %c0_5] : memref<16x16xf32, #tpu.memory_space<vmem>>, vector<16x16xf32>
      tpu.vector_store %arg8[%c0, %c0_5], %13 {strides = array<i32>} : memref<16x16xf32, #tpu.memory_space<vmem>>, vector<16x16xf32>,
    } else {
    }
    %c0_i32_1 = arith.constant 0 : i32
    %5 = arith.cmpi sge, %1, %c0_i32_1 : i32
    %c1_i32_2 = arith.constant 1 : i32
    %6 = arith.cmpi slt, %1, %c1_i32_2 : i32
    %7 = arith.andi %5, %6 : i1
    %8 = arith.extui %7 : i1 to i32
    %c0_i32_3 = arith.constant 0 : i32
    %9 = arith.cmpi ne, %8, %c0_i32_3 : i32
    scf.if %9 {
      %c0 = arith.constant 0 : index
      %c0_5 = arith.constant 0 : index
      %13 = vector.load %arg4[%c0, %c0_5] : memref<16x16xbf16, #tpu.memory_space<vmem>>, vector<16x16xbf16>
      %c0_6 = arith.constant 0 : index
      %c0_7 = arith.constant 0 : index
      %c0_8 = arith.constant 0 : index
      %c0_9 = arith.constant 0 : index
      %14 = vector.load %arg3[%c0_6, %c0_7, %c0_8, %c0_9] : memref<1x1x16x16xf32, #tpu.memory_space<vmem>>, vector<1x1x16x16xf32>
      %15 = vector.shape_cast %14 : vector<1x1x16x16xf32> to vector<16x16xf32>
      %16 = arith.truncf %15 : vector<16x16xf32> to vector<16x16xbf16>
      %c0_10 = arith.constant 0 : index
      %c0_11 = arith.constant 0 : index
      %17 = vector.load %arg8[%c0_10, %c0_11] : memref<16x16xf32, #tpu.memory_space<vmem>>, vector<16x16xf32>
      %cst = arith.constant dense<0.000000e+00> : vector<16x16xf32>
      %18 = tpu.matmul %13, %16, %cst {dimension_numbers = #tpu.dot_dimension_numbers<[1], [0], [0], [1], [0, 0, 1, 1], [], []>} : vector<16x16xbf16>, vector<16x16xbf16>, vector<16x16xf32> -> vector<16x16xf32>
      %19 = arith.addf %17, %18 : vector<16x16xf32>
      %c0_12 = arith.constant 0 : index
      %c0_13 = arith.constant 0 : index
      %20 = vector.load %arg8[%c0_12, %c0_13] : memref<16x16xf32, #tpu.memory_space<vmem>>, vector<16x16xf32>
      tpu.vector_store %arg8[%c0_12, %c0_13], %19 {strides = array<i32>} : memref<16x16xf32, #tpu.memory_space<vmem>>, vector<16x16xf32>,
    } else {
    }
    %c2_i32 = arith.constant 2 : i32
    %10 = arith.cmpi eq, %arg2, %c2_i32 : i32
    %11 = arith.extui %10 : i1 to i32
    %c0_i32_4 = arith.constant 0 : i32
    %12 = arith.cmpi ne, %11, %c0_i32_4 : i32
    scf.if %12 {
      %c0 = arith.constant 0 : index
      %c0_5 = arith.constant 0 : index
      %13 = vector.load %arg8[%c0, %c0_5] : memref<16x16xf32, #tpu.memory_space<vmem>>, vector<16x16xf32>
      %14 = arith.truncf %13 : vector<16x16xf32> to vector<16x16xbf16>
      %c0_6 = arith.constant 0 : index
      %c0_7 = arith.constant 0 : index
      %15 = vector.load %arg5[%c0_6, %c0_7] : memref<16x16xbf16, #tpu.memory_space<vmem>>, vector<16x16xbf16>
      %cst = arith.constant dense<0.000000e+00> : vector<16x16xf32>
      %16 = tpu.matmul %14, %15, %cst {dimension_numbers = #tpu.dot_dimension_numbers<[1], [0], [0], [1], [0, 0, 1, 1], [], []>} : vector<16x16xbf16>, vector<16x16xbf16>, vector<16x16xf32> -> vector<16x16xf32>
      %c0_8 = arith.constant 0 : index
      %c0_9 = arith.constant 0 : index
      %17 = vector.load %arg6[%c0_8, %c0_9] : memref<16x16xf32, #tpu.memory_space<vmem>>, vector<16x16xf32>
      %18 = arith.addf %16, %17 : vector<16x16xf32>
      %c0_10 = arith.constant 0 : index
      %c0_11 = arith.constant 0 : index
      %c0_12 = arith.constant 0 : index
      %c0_13 = arith.constant 0 : index
      %19 = vector.load %arg7[%c0_10, %c0_11, %c0_12, %c0_13] : memref<1x1x16x16xf32, #tpu.memory_space<vmem>>, vector<1x1x16x16xf32>
      %20 = vector.shape_cast %19 : vector<1x1x16x16xf32> to vector<16x16xf32>
      %21 = vector.shape_cast %18 : vector<16x16xf32> to vector<1x1x16x16xf32>
      tpu.vector_store %arg7[%c0_10, %c0_11, %c0_12, %c0_13], %21 {strides = array<i32>} : memref<1x1x16x16xf32, #tpu.memory_space<vmem>>, vector<1x1x16x16xf32>,
    } else {
    }
    return
  }
  func.func @transform_0(%arg0: i32, %arg1: i32, %arg2: i32) -> (i32, i32, i32, i32) {
    %0 = arith.addi %arg1, %arg2 : i32
    %c1_i32 = arith.constant 1 : i32
    %1 = arith.subi %0, %c1_i32 : i32
    %c0_i32 = arith.constant 0 : i32
    %c0_i32_0 = arith.constant 0 : i32
    %2 = arith.maxsi %c0_i32, %1 : i32
    %3 = arith.minsi %c0_i32_0, %2 : i32
    %c1_i32_1 = arith.constant 1 : i32
    %c0_i32_2 = arith.constant 0 : i32
    %c0_i32_3 = arith.constant 0 : i32
    return %arg0, %c1_i32_1, %3, %c0_i32_2 : i32, i32, i32, i32
  }
  func.func @transform_1(%arg0: i32, %arg1: i32, %arg2: i32) -> (i32, i32) {
    %0 = arith.addi %arg1, %arg2 : i32
    %c1_i32 = arith.constant 1 : i32
    %1 = arith.subi %0, %c1_i32 : i32
    %c0_i32 = arith.constant 0 : i32
    %c0_i32_0 = arith.constant 0 : i32
    %2 = arith.maxsi %c0_i32, %1 : i32
    %3 = arith.minsi %c0_i32_0, %2 : i32
    %c0_i32_1 = arith.constant 0 : i32
    return %arg1, %3 : i32, i32
  }
  func.func @transform_2(%arg0: i32, %arg1: i32, %arg2: i32) -> (i32, i32) {
    %c0_i32 = arith.constant 0 : i32
    %c0_i32_0 = arith.constant 0 : i32
    %c0_i32_1 = arith.constant 0 : i32
    return %c0_i32, %c0_i32_0 : i32, i32
  }
  func.func @transform_3(%arg0: i32, %arg1: i32, %arg2: i32) -> (i32, i32) {
    %c0_i32 = arith.constant 0 : i32
    %c0_i32_0 = arith.constant 0 : i32
    return %arg1, %c0_i32 : i32, i32
  }
  func.func @transform_4(%arg0: i32, %arg1: i32, %arg2: i32) -> (i32, i32, i32, i32) {
    %c0_i32 = arith.constant 0 : i32
    %c0_i32_0 = arith.constant 0 : i32
    %c0_i32_1 = arith.constant 0 : i32
    return %arg0, %c0_i32, %arg1, %c0_i32_0 : i32, i32, i32, i32
  }
}

</mosaic_0001>

<bundles_post_ra>
// kernel: tpu_custom_call.1
= control target key start
LH: loop header
LB: loop body
LE: loop exit
PB: predicated region body
PF: predicated region fallthrough
CT: control target
= control target key end

     0   :  { %s1289_s0 = inlined_call_operand.hbm [shape: f32[2,2,16,16], index: 0, kind: input, shape index: {}]   ;;  %s1290_s1 = inlined_call_operand.hbm [shape: bf16[16,16], index: 1, kind: input, shape index: {}]   ;;  %s1291_s2 = inlined_call_operand.hbm [shape: bf16[16,16], index: 2, kind: input, shape index: {}]   ;;  %s1292_s3 = inlined_call_operand.hbm [shape: f32[16,16], index: 3, kind: input, shape index: {}]   ;;  %s1293_s4 = inlined_call_operand.hbm [shape: f32[2,1,16,16], index: 4, kind: output, shape index: {}]  }
   0x1   :  { %1301 = sst [smem:[#allocation21_spill]] %s1291_s2 }
   0x2   :  { %1302 = sst [smem:[#allocation22_spill]] %s1292_s3 }
   0x3   :  { %9 = vsyncpa [#allocation4], 0 }
   0x4   :  { %11 = vsyncpa [#allocation4 + $0x1], 0 }
   0x5   :  { %12 = vsyncpa [#allocation7], 0 }
   0x6   :  { %14 = vsyncpa [#allocation7 + $0x1], 0 }
   0x7   :  { %15 = vsyncpa [#allocation10], 0 }
   0x8   :  { %16 = vsyncpa [#allocation5], 0 }
   0x9   :  { %18 = vsyncpa [#allocation5 + $0x1], 0  ;;  %s1082_s15 = smov 0   ;;  %s1084_s16 = smov 0  }
   0xa   :  { %s1086_s17 = smov 0   ;;  %s1088_s18 = smov 0  }
   0xb   :  { %s1090_s19 = smov 0   ;;  %s1092_s20 = smov 0  }
   0xc   :  { %s1094_s21 = smov 0   ;;  %s1096_s22 = smov 0  }
   0xd LB: > { %1303 = sst [smem:[#allocation17_spill]] %s1037_s20  ;;  %s1123_s23 = sadd.s32 4294967295, %s1045_s22   ;;  %s1045_s22 = sphi %s1096_s22, %s24_s22   ;;  %s1041_s21 = sphi %s1094_s21, %s1321_s21   ;;  %s1037_s20 = sphi %s1092_s20, %s1320_s20   ;;  %s1033_s19 = sphi %s1090_s19, %s1319_s19   ;;  %s1029_s18 = sphi %s1088_s18, %s1318_s18   ;;  %s1025_s17 = sphi %s1086_s17, %s1324_s17   ;;  %s1021_s16 = sphi %s1084_s16, %s1323_s16   ;;  %s1017_s15 = sphi %s1082_s15, %s1322_s15  }
   0xe   : > { %1304 = sst [smem:[#allocation18_spill]] %s1041_s21  ;;  %s628_s24 = sadd.s32 4294967294, %s1045_s22  }
   0xf   : > { %p77_p0 = scmp.ne.s32.totalorder %s1021_s16, %s1017_s15  ;;  %p78_p1 = scmp.eq.s32.totalorder %s1123_s23, 0 }
  0x10   : > { %p190_p2 = scmp.eq.s32.totalorder %s1123_s23, 5  ;;  %p196_p3 = scmp.eq.s32.totalorder %s628_s24, 5 }
  0x11   : > { %p1132_p4 = por %p78_p1, %p77_p0  ;;  %p653_p5 = scmp.ge.s32.totalorder %s1045_s22, 1 }
  0x12   : > { %p1137_p6 = por %p196_p3, %p77_p0  ;;  %p203_p7 = scmp.lt.s32.totalorder %s1045_s22, 7 }
  0x13   : > { %s1307_s2 = sld [smem:[#allocation21_spill]]  ;;  %s1047_s5 = smov [#allocation8]  }
  0x14   : > { %p1145_p8 = pnand %p653_p5, %p203_p7  ;;  %s216_s6 = sshll.u32 %s1047_s5, 4  ;;  %s217_s6 = int_to_ptr.vmem [resolvable:$true] %s216_s6 }
  0x15   : > { %s1309_s3 = sld [smem:[#allocation22_spill]]  ;;  %s1294_s10 = smov 64  }
  0x16   : > { %p717_p9 = pneg %p1145_p8  ;;  %s1295_s11 = smov 4  }
  0x17   : > { %s1050_s12 = smov [#allocation9]   ;;  %s1296_s14 = smov 128  }
  0x18   : > { %p718_p10 = pnand %p717_p9, %p78_p1  ;;  %s233_s13 = sshll.u32 %s1050_s12, 4  ;;  %s234_s13 = int_to_ptr.vmem [resolvable:$true] %s233_s13 }
  0x19   : > { %s214_s29 = sshll.u32 %s1307_s2, 4  ;;  %s1297_s24 = smov 8   ;;  %s215_s29 = int_to_ptr.hbm [resolvable:$true] %s214_s29 }
  0x1a   : > { %720 = dma.hbm_to_vmem [thread:$0]  (!%p718_p10), %s215_s29, 128, %s217_s6, [#allocation7], %s1294_s10, %s1294_s10, %s1295_s11  }
  0x1b   : > { %s231_s9 = sshll.u32 %s1309_s3, 4  ;;  %s36_s27 = sadd.s32 1, %s1037_s20  ;;  %s232_s9 = int_to_ptr.hbm [resolvable:$true] %s231_s9 }
  0x1c   : > { %723 = dma.hbm_to_vmem [thread:$0]  (!%p718_p10), %s232_s9, 256, %s234_s13, [#allocation10], %s1296_s14, %s1296_s14, %s1297_s24  }
  0x1d   : > { %s43_s28 = sadd.s32 1, %s1041_s21  ;;  %p37_p11 = scmp.ge.s32.totalorder %s36_s27, 3 }
  0x1e   : > { %s64_s5 = sadd.s32 1, %s1025_s17  ;;  %p71_p12 = scmp.ne.s32.totalorder %s1025_s17, %s1021_s16 }
  0x1f   : > { %p72_p13 = scmp.eq.s32.totalorder %s1045_s22, 0  ;;  %s1326_s27 = smov (%p37_p11, %s36_s27), 0 }
  0x20   : > { %1310 = sst [smem:[#allocation19_spill]] %s1326_s27  ;;  %s1328_s28 = smov (!%p37_p11, %s43_s28), %s1041_s21 }
  0x21   : > { %p1173_p0 = por %p72_p13, %p71_p12  ;;  %p1179_p3 = por %p190_p2, %p71_p12 }
  0x22   : > { %p45_p5 = scmp.ge.s32.totalorder %s1328_s28, 2  ;;  %p737_p7 = scmp.lt.s32.totalorder %s1045_s22, 6 }
  0x23   : > { %s247_s7 = sand.u32 1, %s1025_s17   ;;  %s699_s8 = sshll.u32 %s1041_s21, 5 }
  0x24   : > { %s1330_s28 = smov (%p45_p5, %s1328_s28), 0  ;;  %s657_s9 = sshll.u32 %s247_s7, 4 }
  0x25   : > { %1313 = sst [smem:[#allocation20_spill]] %s1330_s28  ;;  %s59_s12 = ssub.s32 %s1041_s21, %s1330_s28 }
  0x26   : > { %p62_p9 = scmp.eq.s32.totalorder %s59_s12, 0  ;;  %s527_s11 = scalar_lea.hbm %s1289_s0, %s699_s8 }
  0x27   : > { %s528_s14 = scalar_lea.hbm %s527_s11, 16  ;;  %s251_s24 = scalar_lea.vmem [#allocation3], %s657_s9 }
  0x28   : > { %s268_s2 = sshll.u32 %s251_s24, 4  ;;  %s266_s27 = sshll.u32 %s528_s14, 4  ;;  %s269_s2 = int_to_ptr.vmem [resolvable:$true] %s268_s2  ;;  %s267_s27 = int_to_ptr.hbm [resolvable:$true] %s266_s27 }
  0x29   : > { %s1194_s3 = scalar_select %p62_p9, %s1025_s17, %s64_s5  }
  0x2a   : > { %p725_p2 = pnand %p737_p7, %p1173_p0  ;;  %p728_p10 = pnand %p737_p7, %p72_p13 }
  0x2b   : > { %s278_s28 = sand.u32 1, %s1045_s22   ;;  %s248_s12 = scalar_lea.sflag [#allocation4], %s247_s7 }
  0x2c   : > { %s1314_s21 = smov 8   ;;  %s1315_s20 = smov 128  }
  0x2d   : > { %727 = dma.hbm_to_vmem [thread:$0]  (!%p725_p2), %s267_s27, 256, %s269_s2, %s248_s12, %s1315_s20, %s1315_s20, %s1314_s21  }
  0x2e   : > { %s295_s24 = sshll.u32 %s1290_s1, 4  ;;  %s1053_s14 = smov [#allocation6]   ;;  %s296_s24 = int_to_ptr.hbm [resolvable:$true] %s295_s24 }
  0x2f   : > { %s297_s5 = sshll.u32 %s1053_s14, 4  ;;  %s279_s29 = scalar_lea.sflag [#allocation7], %s278_s28  ;;  %s298_s5 = int_to_ptr.vmem [resolvable:$true] %s297_s5 }
  0x30   : > { %s1316_s8 = smov 4   ;;  %s1317_s9 = smov 64  }
  0x31   : > { %730 = dma.hbm_to_vmem [thread:$0]  (!%p728_p10), %s296_s24, 128, %s298_s5, %s279_s29, %s1317_s9, %s1317_s9, %s1316_s8  }
  0x32   : > { %309 = sbr.rel (%p1145_p8) target bundleno = 390 (0x186), region = 36  ;;  %s1217_s7 = sand.u32 (!%p1145_p8), 1, %s1021_s16  }
  0x33   : > { %s676_s2 = sshll.u32 (!%p1145_p8), %s1217_s7, 4  ;;  %s312_s20 = scalar_lea.sflag (!%p1145_p8), [#allocation4], %s1217_s7 }
  0x34   : > { %s315_s21 = scalar_lea.vmem (!%p1145_p8), [#allocation3], %s676_s2 }
  0x37   : > { %996 = dma.done.wait (%p1132_p4), %s312_s20, 256  }
  0x38   : > { %998 = vsyncadd (%p1132_p4), %s312_s20, 4294967040  ;;  %s321_s27 = sand.u32 1, %s1123_s23  }
  0x39   : > { %s322_s28 = scalar_lea.sflag [#allocation7], %s321_s27 }
  0x3a   : > { %1000 = dma.done.wait (%p78_p1), %s322_s28, 128  }
  0x3b   : > { %1002 = vsyncadd (%p78_p1), %s322_s28, 4294967168 }
  0x3c   : > { %1004 = dma.done.wait (%p78_p1), [#allocation7], 128  }
  0x3d   : > { %1006 = vsyncadd (%p78_p1), [#allocation7], 4294967168 }
  0x3e   : > { %1008 = dma.done.wait (%p78_p1), [#allocation10], 256  }
  0x3f   : > { %1010 = vsyncadd (%p78_p1), [#allocation10], 4294967040  ;;  %s681_s25 = sadd.s32 4294967295, %s1029_s18  ;;  %s1239_s30 = scalar_lea.vmem [#allocation11], %s676_s2 }
  0x40   : > { %p682_p4 = scmp.ne.s32.totalorder %s1029_s18, 0 }
  0x42   : > { %388 = sbr.rel (%p682_p4) target bundleno = 74 (0x4a), region = 56 }
  0x47   : > { %vm389_vm0 = vcmask 130048   ;;  %v1054_v0 = vmov 0.0  }
  0x48   : > { %390 = vst.msk [vmem:[#allocation2] sm:$0xff] %vm389_vm0, %v1054_v0 }
  0x49   : > { %391 = vst.msk [vmem:[#allocation2 + $0x8] sm:$0xff] %vm389_vm0, %v1054_v0 }
  0x4a PF: > { %p392_p8 = scmp.ge.s32.totalorder %s681_s25, 0  ;;  %p393_p11 = scmp.lt.s32.totalorder %s681_s25, 1 }
  0x4c   : > { %p394_p12 = pnand %p393_p11, %p392_p8 }
  0x4e   : > { %397 = sbr.rel (%p394_p12) target bundleno = 226 (0xe2), region = 60 }
  0x53   : > { %v400_v1 = vld [vmem:[%s315_s21] sm:$0xff]  ;;  %v401_v2 = vld [vmem:[%s315_s21 + $0x8] sm:$0xff]  ;;  %vm410_vm1 = vcmask 130048  }
  0x54   : > { %v402_v3 = vpack.c.bf16 %v401_v2, %v400_v1  ;;  %v700_v4 = vld [vmem:[#allocation6] sm:$0xff]  ;;  %v403_v5 = vld [vmem:[#allocation2] sm:$0xff]  ;;  %v404_v8 = vld [vmem:[#allocation2 + $0x8] sm:$0xff] }
  0x56   : > { %421 = vmatpush.bf16.msra.mxu0 %v402_v3 }
  0x59   : > { %687 = vmatmul.msk.bf16.vlgmr.msra.gmra.mxu0 %vm410_vm1, %v700_v4 }
  0xd6   : > { %v423_v6 = vpop.f32.mrf.mxu0 }
  0xd7   : > { %v428_v7 = vadd.f32 %v423_v6, %v403_v5 }
  0xd9   : > { %430 = vst.msk [vmem:[#allocation2] sm:$0xff] %vm410_vm1, %v428_v7 }
  0xde   : > { %v425_v9 = vpop.f32.mrf.mxu0 }
  0xdf   : > { %v429_v10 = vadd.f32 %v425_v9, %v404_v8 }
  0xe1   : > { %431 = vst.msk [vmem:[#allocation2 + $0x8] sm:$0xff] %vm410_vm1, %v429_v10 }
  0xe2 PF: > { %p688_p1 = scmp.ne.s32.totalorder %s1029_s18, 2 }
  0xe4   : > { %435 = sbr.rel (%p688_p1) target bundleno = 374 (0x176), region = 64 }
  0xe9   : > { %v701_v11 = vld [vmem:[#allocation8] sm:$0xff]  ;;  %v437_v13 = vld [vmem:[#allocation2 + $0x8] sm:$0xff]  ;;  %vm449_vm2 = vcmask 130048   ;;  %v442_v18 = vld [vmem:[#allocation9 + $0x8] sm:$0xff] }
  0xea   : > { %v436_v12 = vld [vmem:[#allocation2] sm:$0xff]  ;;  %460 = vmatpush.bf16.msra.mxu0 %v701_v11  ;;  %v441_v15 = vld [vmem:[#allocation9] sm:$0xff] }
  0xeb   : > { %v438_v14 = vpack.c.bf16 %v437_v13, %v436_v12 }
  0xed   : > { %693 = vmatmul.msk.bf16.vlgmr.msra.gmra.mxu0 %vm449_vm2, %v438_v14 }
 0x16a   : > { %v462_v16 = vpop.f32.mrf.mxu0 }
 0x16b   : > { %v463_v17 = vadd.f32 %v462_v16, %v441_v15 }
 0x16d   : > { %467 = vst.msk [vmem:[%s1239_s30] sm:$0xff] %vm449_vm2, %v463_v17 }
 0x172   : > { %v464_v19 = vpop.f32.mrf.mxu0 }
 0x173   : > { %v465_v20 = vadd.f32 %v464_v19, %v442_v18 }
 0x175   : > { %468 = vst.msk [vmem:[%s1239_s30 + $0x8] sm:$0xff] %vm449_vm2, %v465_v20 }
 0x176 PF: > { %s702_s18 = sshll.u32 %s1033_s19, 4  ;;  %s484_s10 = sshll.u32 %s1239_s30, 4  ;;  %s485_s10 = int_to_ptr.vmem [resolvable:$true] %s484_s10 }
 0x177   : > { %s483_s12 = scalar_lea.hbm %s1293_s4, %s702_s18  ;;  %s470_s24 = scalar_lea.sflag [#allocation5], %s1217_s7 }
 0x178   : > { %s486_s11 = sshll.u32 %s483_s12, 4  ;;  %s955_s19 = scalar_lea.hbm %s1293_s4, 32  ;;  %s487_s11 = int_to_ptr.hbm [resolvable:$true] %s486_s11 }
 0x179   : > { %s949_s14 = sshra.s32 %s487_s11, 4  ;;  %s950_s14 = int_to_ptr.hbm [resolvable:$true] %s949_s14 }
 0x17a   : > { %s951_s5 = scalar_lea.hbm %s950_s14, 16  ;;  %p956_p7 = scmp.lt.s32.totalorder %s950_s14, %s1293_s4 }
 0x17b   : > { %p952_p13 = scmp.ne.s32.totalorder %s950_s14, %s951_s5  ;;  %p957_p9 = scmp.lt.s32.totalorder %s955_s19, %s951_s5 }
 0x17d   : > { %p953_p0 = pnand %p952_p13, %p1179_p3  ;;  %p958_p2 = por %p957_p9, %p956_p7 }
 0x17f   : > { %p954_p5 = pneg %p953_p0 }
 0x181   : > { %p959_p10 = pnand %p958_p2, %p954_p5 }
 0x183   : > { %962 = shalt.err (!%p959_p10)
}
 0x184   : > { %s1055_s7 = smov 128   ;;  %s1056_s20 = smov 8  }
 0x185   : > { %715 = dma.vmem_to_hbm [thread:$0]  (%p1179_p3), %s485_s10, 256, %s487_s11, %s470_s24, %s1055_s7, %s1055_s7, %s1056_s20  }
 0x186 PF: > { %p740_p4 = scmp.ge.s32.totalorder %s1045_s22, 2  ;;  %s501_s21 = sand.u32 1, %s1017_s15  }
 0x187   : > { %s502_s27 = scalar_lea.sflag [#allocation5], %s501_s21 }
 0x188   : > { %p732_p8 = pnand %p740_p4, %p1137_p6 }
 0x18a   : > { %p733_p11 = pneg %p732_p8 }
 0x18c   : > { %1012 = dma.done.wait (%p733_p11), %s502_s27, 256  }
 0x18d   : > { %1014 = vsyncadd (%p733_p11), %s502_s27, 4294967040  ;;  %s24_s22 = sadd.s32 1, %s1045_s22   ;;  %s1318_s18 = sld [smem:[#allocation17_spill]] }
 0x18e   : > { %p21_p12 = scmp.ge.s32.totalorder %s24_s22, 8   ;;  %s1319_s19 = sld [smem:[#allocation18_spill]] }
 0x18f   : > { %s1320_s20 = sld [smem:[#allocation19_spill]]  ;;  %s1322_s15 = smov %s1021_s16 }
 0x190   : > { %s1321_s21 = sld [smem:[#allocation20_spill]]  ;;  %s1323_s16 = smov %s1025_s17 }
 0x191   : > { %s1324_s17 = smov %s1194_s3  ;;  %23 = sbr.rel (!%p21_p12) target bundleno = 13 (0xd), region = 115 }
 0x196   :  { %508 = vsyncpa [#allocation4], 1 }
 0x197   :  { %510 = vsyncpa [#allocation4 + $0x1], 1 }
 0x198   :  { %511 = vsyncpa [#allocation7], 1 }
 0x199   :  { %513 = vsyncpa [#allocation7 + $0x1], 1 }
 0x19a   :  { %514 = vsyncpa [#allocation10], 1 }
 0x19b   :  { %515 = vsyncpa [#allocation5], 1 }
 0x19c   :  { %517 = vsyncpa [#allocation5 + $0x1], 1 }

</bundles_post_ra>
